<compile_context>
chip_gen: v5e
topology: v5e:2x2
jax: 0.10.0
libtpu: 0.0.40
codegen_flags: <defaults>
</compile_context>

<pallas_src>
from typing import NamedTuple, Optional

import jax
import jax.numpy as jnp
from jax.experimental import pallas as pl
from jax.experimental.pallas import tpu as pltpu


def _round_up(n: int, m: int) -> int:
    return ((n + m - 1) // m) * m


def _pad_axis(a, axis, target):
    pad = target - a.shape[axis]
    if pad == 0:
        return a
    widths = [(0, 0)] * a.ndim
    widths[axis] = (0, pad)
    return jnp.pad(a, widths)


# ---------------------------------------------------------------------------
# Kernel
# ---------------------------------------------------------------------------
def swiglu_kernel(x_ref, w13_ref, b13_ref, w2_ref, b2_ref, o_ref, acc_ref):
    """Grid = (row tiles i, hidden tiles j).  For each hidden tile j:
         h13  = x @ [W1_j | W3_j] + [b1_j | b3_j]   (one MXU dot, f32 accum)
         acc (+)= (silu(h1) * h3) @ W2_j            (MXU, f32 accum)
       Epilogue (last j): out = acc + b2."""
    j = pl.program_id(1)

    x = x_ref[...]                                       # (tm, insize_p), compute dtype
    h13 = jnp.dot(x, w13_ref[...],
                  preferred_element_type=jnp.float32) + b13_ref[...]
    th = h13.shape[1] // 2
    h1 = h13[:, :th]
    h3 = h13[:, th:]
    gated = (h1 * jax.nn.sigmoid(h1)) * h3               # SiLU + gate in f32 (VPU/EUP)

    contrib = jnp.dot(gated.astype(w2_ref.dtype), w2_ref[...],
                      preferred_element_type=jnp.float32)

    @pl.when(j == 0)
    def _():                                             # direct write: no zero-fill
        acc_ref[...] = contrib

    @pl.when(j > 0)
    def _():
        acc_ref[...] += contrib

    @pl.when(j == pl.num_programs(1) - 1)
    def _():
        o_ref[...] = (acc_ref[...] + b2_ref[...]).astype(o_ref.dtype)


# ---------------------------------------------------------------------------
# One-time weight preparation (do this at model init, NOT per forward call)
# ---------------------------------------------------------------------------
class SwiGLUParams(NamedTuple):
    w13: jax.Array   # (insize_p, 2*hid_p)  compute dtype; block j = [W1_j | W3_j]
    b13: jax.Array   # (1, 2*hid_p)         f32;           block j = [b1_j | b3_j]
    w2: jax.Array    # (hid_p, outsize_p)   compute dtype
    b2: jax.Array    # (1, outsize_p)       f32
    insize: int
    hidsize: int
    outsize: int
    th: int          # hidden tile used for the W1|W3 interleave


def prepare_swiglu_params(w1, b1, w3, b3, w2, b2, *,
                          th: int = 256,
                          compute_dtype=jnp.bfloat16) -> SwiGLUParams:
    """w1/w3: (insize, hidsize); w2: (hidsize, outsize); b*: (1, dim) or None."""
    insize, hidsize = w1.shape
    outsize = w2.shape[1]

    insize_p = _round_up(insize, 128)
    outsize_p = _round_up(outsize, 128)
    th_eff = min(th, _round_up(hidsize, 128))
    th_eff = _round_up(th_eff, 128)
    hid_p = _round_up(hidsize, th_eff)
    nh = hid_p // th_eff

    if b1 is None:
        b1 = jnp.zeros((1, hidsize), jnp.float32)
    if b3 is None:
        b3 = jnp.zeros((1, hidsize), jnp.float32)
    if b2 is None:
        b2 = jnp.zeros((1, outsize), jnp.float32)

    # Zero padding is exact through both matmuls and the gating (silu(0)*h3 = 0).
    w1p = _pad_axis(_pad_axis(w1, 0, insize_p), 1, hid_p)
    w3p = _pad_axis(_pad_axis(w3, 0, insize_p), 1, hid_p)
    b1p = _pad_axis(jnp.reshape(b1, (1, -1)), 1, hid_p).astype(jnp.float32)
    b3p = _pad_axis(jnp.reshape(b3, (1, -1)), 1, hid_p).astype(jnp.float32)

    # Fuse per hidden tile: block j holds [W1[:, j*th:(j+1)*th] | W3[:, ...]].
    w13 = jnp.concatenate(
        [w1p.reshape(insize_p, nh, th_eff), w3p.reshape(insize_p, nh, th_eff)],
        axis=2).reshape(insize_p, 2 * hid_p).astype(compute_dtype)
    b13 = jnp.concatenate(
        [b1p.reshape(1, nh, th_eff), b3p.reshape(1, nh, th_eff)],
        axis=2).reshape(1, 2 * hid_p)

    w2p = _pad_axis(_pad_axis(w2, 0, hid_p), 1, outsize_p).astype(compute_dtype)
    b2p = _pad_axis(jnp.reshape(b2, (1, -1)), 1, outsize_p).astype(jnp.float32)

    return SwiGLUParams(w13, b13, w2p, b2p, insize, hidsize, outsize, th_eff)


# ---------------------------------------------------------------------------
# Tile / VMEM-limit selection helpers
# ---------------------------------------------------------------------------
def _choose_tm(M: int, tm_max: int) -> int:
    """Pick a row tile <= tm_max that avoids pathological row padding.
    Cost model: compute ~ padded rows, weight streaming ~ #row-tiles * ~512
    row-equivalents (bf16 compute/BW breakeven)."""
    tm_max = max(8, _round_up(tm_max, 8))
    M8 = _round_up(max(M, 1), 8)
    if M8 <= tm_max:
        return M8
    candidates = [c for c in range(256, tm_max + 1, 128)]
    if tm_max not in candidates:
        candidates.append(tm_max)
    best_key, best_c = None, None
    for c in candidates:
        padded = _round_up(M8, c)
        steps = padded // c
        cost = max(padded, steps * 512)
        key = (cost, padded, -c)
        if best_key is None or key < best_key:
            best_key, best_c = key, c
    return best_c


def _compute_vmem_limit(tm, insize_p, th, outsize_p, compute_dtype, out_dtype) -> int:
    cdb = jnp.dtype(compute_dtype).itemsize
    odb = jnp.dtype(out_dtype).itemsize
    dbl = 2  # default double buffering per pipelined BlockSpec
    need = (tm * insize_p * cdb * dbl            # x tile
            + insize_p * 2 * th * cdb * dbl      # [W1|W3] tile
            + 8 * 2 * th * 4 * dbl               # [b1|b3] tile (sublane-padded)
            + th * outsize_p * cdb * dbl         # W2 tile
            + 8 * outsize_p * 4 * dbl            # b2 tile
            + tm * outsize_p * odb * dbl         # output tile
            + tm * outsize_p * 4)                # f32 accumulator (single buffer)
    need = int(need * 1.15) + (2 << 20)          # compiler scratch / headroom
    need = max(need, 32 << 20)                   # never below the default scoped limit
    try:
        phys = int(pltpu.get_tpu_info().vmem_capacity_bytes)
    except Exception:
        phys = 64 << 20                          # smallest across v5e/v6e/v7x
    return min(need, int(phys * 0.9))


# ---------------------------------------------------------------------------
# Forward wrapper
# ---------------------------------------------------------------------------
def swiglu_pallas(x, params: SwiGLUParams, *,
                  tm: int = 512,                 # 512+ keeps v5e/v6e/v7x MXU-bound
                  vmem_limit_bytes: Optional[int] = None):
    """x: (..., insize).  Returns (..., outsize) in x.dtype."""
    orig_dtype = x.dtype
    lead = x.shape[:-1]
    insize = x.shape[-1]
    assert insize == params.insize, (insize, params.insize)

    M = 1
    for d in lead:
        M *= d
    x2 = x.reshape(M, insize)

    cd = params.w13.dtype
    insize_p = params.w13.shape[0]
    hid_p = params.w13.shape[1] // 2
    outsize_p = params.w2.shape[1]
    th = params.th
    nh = hid_p // th

    tm_eff = _choose_tm(M, tm)
    M_p = _round_up(M, tm_eff)
    xp = _pad_axis(_pad_axis(x2, 1, insize_p), 0, M_p).astype(cd)

    if vmem_limit_bytes is None:
        vmem_limit_bytes = _compute_vmem_limit(tm_eff, insize_p, th, outsize_p,
                                               cd, orig_dtype)

    grid = (M_p // tm_eff, nh)

    out_p = pl.pallas_call(
        swiglu_kernel,
        out_shape=jax.ShapeDtypeStruct((M_p, outsize_p), orig_dtype),
        grid_spec=pltpu.PrefetchScalarGridSpec(
            num_scalar_prefetch=0,
            grid=grid,
            in_specs=[
                pl.BlockSpec((tm_eff, insize_p), lambda i, j: (i, 0)),      # x tile
                pl.BlockSpec((insize_p, 2 * th), lambda i, j: (0, j)),      # [W1|W3] tile
                pl.BlockSpec((1, 2 * th), lambda i, j: (0, j)),             # [b1|b3] tile
                pl.BlockSpec((th, outsize_p), lambda i, j: (j, 0)),         # W2 tile
                pl.BlockSpec((1, outsize_p), lambda i, j: (0, 0)),          # b2
            ],
            out_specs=pl.BlockSpec((tm_eff, outsize_p), lambda i, j: (i, 0)),
            scratch_shapes=[pltpu.VMEM((tm_eff, outsize_p), jnp.float32)],
        ),
        compiler_params=pltpu.CompilerParams(
            dimension_semantics=("parallel", "arbitrary"),
            vmem_limit_bytes=vmem_limit_bytes),
    )(xp, params.w13, params.b13, params.w2, params.b2)

    out = out_p[:M, :params.outsize]
    return out.reshape(*lead, params.outsize)


# ---------------------------------------------------------------------------
# Pure-JAX reference (matches the PyTorch module semantics)
# ---------------------------------------------------------------------------
def swiglu_ref(x, w1, b1, w3, b3, w2, b2, compute_dtype=None):
    cd = compute_dtype if compute_dtype is not None else x.dtype
    xc = x.astype(cd)
    h1 = jnp.dot(xc, w1.astype(cd), preferred_element_type=jnp.float32) + b1
    h3 = jnp.dot(xc, w3.astype(cd), preferred_element_type=jnp.float32) + b3
    gated = (h1 * jax.nn.sigmoid(h1)) * h3
    out = jnp.dot(gated.astype(cd), w2.astype(cd),
                  preferred_element_type=jnp.float32) + b2
    return out.astype(x.dtype)


if __name__ == "__main__":
    # SwiGLU(insize=32, outsize=32, bias=True) -> hidsize = 4 * 32 = 128
    insize, outsize = 32, 32
    hidsize = insize * 4
    batch, seq = 2, 8

    key = jax.random.PRNGKey(0)
    kx, k1, kb1, k3, kb3, k2, kb2 = jax.random.split(key, 7)

    # Deterministic synthetic parameters, stored directly in (in, out) layout.
    x = jax.random.normal(kx, (batch, seq, insize), dtype=jnp.float32)
    w1 = jax.random.normal(k1, (insize, hidsize), dtype=jnp.float32) * 0.05
    b1 = jax.random.normal(kb1, (1, hidsize), dtype=jnp.float32) * 0.05
    w3 = jax.random.normal(k3, (insize, hidsize), dtype=jnp.float32) * 0.05
    b3 = jax.random.normal(kb3, (1, hidsize), dtype=jnp.float32) * 0.05
    w2 = jax.random.normal(k2, (hidsize, outsize), dtype=jnp.float32) * 0.05
    b2 = jax.random.normal(kb2, (1, outsize), dtype=jnp.float32) * 0.05

    # 1) Exact-semantics f32-fed path (matches the PyTorch module numerics).
    params_f32 = prepare_swiglu_params(w1, b1, w3, b3, w2, b2,
                                       compute_dtype=jnp.float32)
    out_f32 = jax.block_until_ready(swiglu_pallas(x, params_f32))
    ref_f32 = swiglu_ref(x, w1, b1, w3, b3, w2, b2)
    assert out_f32.shape == (batch, seq, outsize)
    assert jnp.allclose(out_f32, ref_f32, atol=1e-5, rtol=1e-5), (
        float(jnp.max(jnp.abs(out_f32 - ref_f32))))

    # 2) Production path: bf16-fed MXU operands (f32 bias/SiLU/gating/accum),
    #    compared against a reference applying the same casts.
    params_bf16 = prepare_swiglu_params(w1, b1, w3, b3, w2, b2)  # bf16 default
    out_bf = jax.block_until_ready(swiglu_pallas(x, params_bf16))
    ref_bf = swiglu_ref(x, w1, b1, w3, b3, w2, b2, compute_dtype=jnp.bfloat16)
    assert out_bf.shape == (batch, seq, outsize)
    assert jnp.allclose(out_bf, ref_bf, atol=2e-2, rtol=2e-2), (
        float(jnp.max(jnp.abs(out_bf - ref_bf))))

    print("KERNEL_OK")
</pallas_src>

<mosaic_0001>
module attributes {stable_mosaic.version = 11 : i64} {
  func.func @swiglu_kernel(%arg0: i32, %arg1: i32, %arg2: memref<16x128xf32, #tpu.memory_space<vmem>>, %arg3: memref<128x256xf32, #tpu.memory_space<vmem>>, %arg4: memref<1x256xf32, #tpu.memory_space<vmem>>, %arg5: memref<128x128xf32, #tpu.memory_space<vmem>>, %arg6: memref<1x128xf32, #tpu.memory_space<vmem>>, %arg7: memref<16x128xf32, #tpu.memory_space<vmem>>, %arg8: memref<16x128xf32, #tpu.memory_space<vmem>>) attributes {dimension_semantics = [#tpu.dimension_semantics<parallel>, #tpu.dimension_semantics<arbitrary>], iteration_bounds = array<i64: 1, 1>, scalar_prefetch = 0 : i64, scratch_operands = 1 : i64, tpu.core_type = #tpu.core_type<tc>, window_params = [{transform_indices = @transform_0, window_bounds = array<i64: 16, 128>}, {transform_indices = @transform_1, window_bounds = array<i64: 128, 256>}, {transform_indices = @transform_2, window_bounds = array<i64: 1, 256>}, {transform_indices = @transform_3, window_bounds = array<i64: 128, 128>}, {pipeline_mode = #tpu.pipeline_mode<synchronous>, transform_indices = @transform_4, window_bounds = array<i64: 1, 128>}, {transform_indices = @transform_5, window_bounds = array<i64: 16, 128>}]} {
    %c0 = arith.constant 0 : index
    %c0_0 = arith.constant 0 : index
    %0 = vector.load %arg2[%c0, %c0_0] : memref<16x128xf32, #tpu.memory_space<vmem>>, vector<16x128xf32>
    %c0_1 = arith.constant 0 : index
    %c0_2 = arith.constant 0 : index
    %1 = vector.load %arg3[%c0_1, %c0_2] : memref<128x256xf32, #tpu.memory_space<vmem>>, vector<128x256xf32>
    %cst = arith.constant dense<0.000000e+00> : vector<16x256xf32>
    %2 = tpu.matmul %0, %1, %cst {dimension_numbers = #tpu.dot_dimension_numbers<[1], [0], [0], [1], [0, 0, 1, 1], [], []>} : vector<16x128xf32>, vector<128x256xf32>, vector<16x256xf32> -> vector<16x256xf32>
    %c0_3 = arith.constant 0 : index
    %c0_4 = arith.constant 0 : index
    %3 = vector.load %arg4[%c0_3, %c0_4] : memref<1x256xf32, #tpu.memory_space<vmem>>, vector<1x256xf32>
    %4 = vector.broadcast %3 : vector<1x256xf32> to vector<16x256xf32>
    %5 = arith.addf %2, %4 : vector<16x256xf32>
    %6 = vector.extract_strided_slice %5 {offsets = [0, 0], sizes = [16, 128], strides = [1, 1]} : vector<16x256xf32> to vector<16x128xf32>
    %7 = vector.extract_strided_slice %5 {offsets = [0, 128], sizes = [16, 128], strides = [1, 1]} : vector<16x256xf32> to vector<16x128xf32>
    %8 = arith.negf %6 : vector<16x128xf32>
    %9 = math.exp %8 : vector<16x128xf32>
    %cst_5 = arith.constant 1.000000e+00 : f32
    %10 = vector.broadcast %cst_5 : f32 to vector<16x128xf32>
    %11 = arith.addf %10, %9 : vector<16x128xf32>
    %12 = arith.divf %10, %11 : vector<16x128xf32>
    %13 = arith.mulf %6, %12 : vector<16x128xf32>
    %14 = arith.mulf %13, %7 : vector<16x128xf32>
    %c0_6 = arith.constant 0 : index
    %c0_7 = arith.constant 0 : index
    %15 = vector.load %arg5[%c0_6, %c0_7] : memref<128x128xf32, #tpu.memory_space<vmem>>, vector<128x128xf32>
    %cst_8 = arith.constant dense<0.000000e+00> : vector<16x128xf32>
    %16 = tpu.matmul %14, %15, %cst_8 {dimension_numbers = #tpu.dot_dimension_numbers<[1], [0], [0], [1], [0, 0, 1, 1], [], []>} : vector<16x128xf32>, vector<128x128xf32>, vector<16x128xf32> -> vector<16x128xf32>
    %c0_i32 = arith.constant 0 : i32
    %17 = arith.cmpi eq, %arg1, %c0_i32 : i32
    %18 = arith.extui %17 : i1 to i32
    %c0_i32_9 = arith.constant 0 : i32
    %19 = arith.cmpi ne, %18, %c0_i32_9 : i32
    scf.if %19 {
      %c0_14 = arith.constant 0 : index
      %c0_15 = arith.constant 0 : index
      %26 = vector.load %arg8[%c0_14, %c0_15] : memref<16x128xf32, #tpu.memory_space<vmem>>, vector<16x128xf32>
      tpu.vector_store %arg8[%c0_14, %c0_15], %16 {strides = array<i32>} : memref<16x128xf32, #tpu.memory_space<vmem>>, vector<16x128xf32>,
    } else {
    }
    %c0_i32_10 = arith.constant 0 : i32
    %20 = arith.cmpi sgt, %arg1, %c0_i32_10 : i32
    %21 = arith.extui %20 : i1 to i32
    %c0_i32_11 = arith.constant 0 : i32
    %22 = arith.cmpi ne, %21, %c0_i32_11 : i32
    scf.if %22 {
      %c0_14 = arith.constant 0 : index
      %c0_15 = arith.constant 0 : index
      %26 = vector.load %arg8[%c0_14, %c0_15] : memref<16x128xf32, #tpu.memory_space<vmem>>, vector<16x128xf32>
      %27 = arith.addf %26, %16 : vector<16x128xf32>
      %c0_16 = arith.constant 0 : index
      %c0_17 = arith.constant 0 : index
      %28 = vector.load %arg8[%c0_16, %c0_17] : memref<16x128xf32, #tpu.memory_space<vmem>>, vector<16x128xf32>
      tpu.vector_store %arg8[%c0_16, %c0_17], %27 {strides = array<i32>} : memref<16x128xf32, #tpu.memory_space<vmem>>, vector<16x128xf32>,
    } else {
    }
    %c0_i32_12 = arith.constant 0 : i32
    %23 = arith.cmpi eq, %arg1, %c0_i32_12 : i32
    %24 = arith.extui %23 : i1 to i32
    %c0_i32_13 = arith.constant 0 : i32
    %25 = arith.cmpi ne, %24, %c0_i32_13 : i32
    scf.if %25 {
      %c0_14 = arith.constant 0 : index
      %c0_15 = arith.constant 0 : index
      %26 = vector.load %arg8[%c0_14, %c0_15] : memref<16x128xf32, #tpu.memory_space<vmem>>, vector<16x128xf32>
      %c0_16 = arith.constant 0 : index
      %c0_17 = arith.constant 0 : index
      %27 = vector.load %arg6[%c0_16, %c0_17] : memref<1x128xf32, #tpu.memory_space<vmem>>, vector<1x128xf32>
      %28 = vector.broadcast %27 : vector<1x128xf32> to vector<16x128xf32>
      %29 = arith.addf %26, %28 : vector<16x128xf32>
      %c0_18 = arith.constant 0 : index
      %c0_19 = arith.constant 0 : index
      %30 = vector.load %arg7[%c0_18, %c0_19] : memref<16x128xf32, #tpu.memory_space<vmem>>, vector<16x128xf32>
      tpu.vector_store %arg7[%c0_18, %c0_19], %29 {strides = array<i32>} : memref<16x128xf32, #tpu.memory_space<vmem>>, vector<16x128xf32>,
    } else {
    }
    return
  }
  func.func @transform_0(%arg0: i32, %arg1: i32) -> (i32, i32) {
    %c0_i32 = arith.constant 0 : i32
    %c0_i32_0 = arith.constant 0 : i32
    return %arg0, %c0_i32 : i32, i32
  }
  func.func @transform_1(%arg0: i32, %arg1: i32) -> (i32, i32) {
    %c0_i32 = arith.constant 0 : i32
    %c0_i32_0 = arith.constant 0 : i32
    return %c0_i32, %arg1 : i32, i32
  }
  func.func @transform_2(%arg0: i32, %arg1: i32) -> (i32, i32) {
    %c0_i32 = arith.constant 0 : i32
    %c0_i32_0 = arith.constant 0 : i32
    return %c0_i32, %arg1 : i32, i32
  }
  func.func @transform_3(%arg0: i32, %arg1: i32) -> (i32, i32) {
    %c0_i32 = arith.constant 0 : i32
    %c0_i32_0 = arith.constant 0 : i32
    return %arg1, %c0_i32 : i32, i32
  }
  func.func @transform_4(%arg0: i32, %arg1: i32) -> (i32, i32) {
    %c0_i32 = arith.constant 0 : i32
    %c0_i32_0 = arith.constant 0 : i32
    %c0_i32_1 = arith.constant 0 : i32
    return %c0_i32, %c0_i32_0 : i32, i32
  }
  func.func @transform_5(%arg0: i32, %arg1: i32) -> (i32, i32) {
    %c0_i32 = arith.constant 0 : i32
    %c0_i32_0 = arith.constant 0 : i32
    return %arg0, %c0_i32 : i32, i32
  }
}

</mosaic_0001>

<bundles_post_ra>
// kernel: tpu_custom_call.1
= control target key start
LH: loop header
LB: loop body
LE: loop exit
PB: predicated region body
PF: predicated region fallthrough
CT: control target
= control target key end

     0   :  { %10 = vsyncpa [#allocation4], 0  ;;  %s529_s0 = inlined_call_operand.hbm [shape: f32[16,128], index: 0, kind: input, shape index: {}]   ;;  %s530_s1 = inlined_call_operand.hbm [shape: f32[128,256], index: 1, kind: input, shape index: {}]   ;;  %s531_s2 = inlined_call_operand.hbm [shape: f32[1,256], index: 2, kind: input, shape index: {}]   ;;  %s532_s3 = inlined_call_operand.hbm [shape: f32[128,128], index: 3, kind: input, shape index: {}]   ;;  %s533_s4 = inlined_call_operand.vmem [shape: f32[1,128], index: 4, kind: input, shape index: {}]   ;;  %s534_s5 = inlined_call_operand.hbm [shape: f32[16,128], index: 5, kind: output, shape index: {}]  }
   0x1   :  { %11 = vsyncpa [#allocation7], 0 }
   0x2   :  { %12 = vsyncpa [#allocation10], 0  ;;  %s31_s20 = sshll.u32 %s530_s1, 4  ;;  %s32_s20 = int_to_ptr.hbm [resolvable:$true] %s31_s20 }
   0x3   :  { %13 = vsyncpa [#allocation5], 0  ;;  %s463_s21 = smov [#allocation6]   ;;  %s18_s25 = sshll.u32 %s529_s0, 4  ;;  %s19_s25 = int_to_ptr.hbm [resolvable:$true] %s18_s25 }
   0x4   :  { %s33_s22 = sshll.u32 %s463_s21, 4  ;;  %s464_s26 = smov 256   ;;  %s34_s22 = int_to_ptr.vmem [resolvable:$true] %s33_s22 }
   0x5   :  { %s465_s27 = smov 16   ;;  %s466_s28 = smov [#allocation3]  }
   0x6   :  { %39 = dma.hbm_to_vmem [thread:$0]  %s32_s20, 4096, %s34_s22, [#allocation7], %s464_s26, %s464_s26, %s465_s27  }
   0x7   :  { %s20_s29 = sshll.u32 %s466_s28, 4  ;;  %s467_s30 = smov 128   ;;  %s21_s29 = int_to_ptr.vmem [resolvable:$true] %s20_s29 }
   0x8   :  { %s468_s6 = smov 8   ;;  %s45_s8 = sshll.u32 %s531_s2, 4  ;;  %s46_s8 = int_to_ptr.hbm [resolvable:$true] %s45_s8 }
   0x9   :  { %26 = dma.hbm_to_vmem [thread:$0]  %s19_s25, 256, %s21_s29, [#allocation4], %s467_s30, %s467_s30, %s468_s6  }
   0xa   :  { %s469_s9 = smov [#allocation8]   ;;  %s55_s12 = sshll.u32 %s532_s3, 4  ;;  %s56_s12 = int_to_ptr.hbm [resolvable:$true] %s55_s12 }
   0xb   :  { %s47_s0 = sshll.u32 %s469_s9, 4  ;;  %s470_s13 = smov [#allocation9]   ;;  %s48_s0 = int_to_ptr.vmem [resolvable:$true] %s47_s0 }
   0xc   :  { %50 = dma.hbm_to_vmem [thread:$0]  %s46_s8, 32, %s48_s0, [#allocation7]  }
   0xd   :  { %s57_s14 = sshll.u32 %s470_s13, 4  ;;  %s58_s14 = int_to_ptr.vmem [resolvable:$true] %s57_s14 }
   0xe   :  { %63 = dma.hbm_to_vmem [thread:$0]  %s56_s12, 2048, %s58_s14, [#allocation10], %s467_s30, %s467_s30, %s468_s6  }
   0xf   :  { %455 = dma.done.wait [#allocation4], 256  }
  0x10   :  { %456 = vsyncadd [#allocation4], 4294967040 }
  0x11   :  { %457 = dma.done.wait [#allocation7], 4128  }
  0x12   :  { %458 = vsyncadd [#allocation7], 4294963168 }
  0x13   :  { %459 = dma.done.wait [#allocation10], 2048  }
  0x14   :  { %460 = vsyncadd [#allocation10], 4294965248  ;;  %v114_v0 = vld [vmem:[#allocation6 + $0xf0] sm:$0xff]  ;;  %v112_v1 = vld [vmem:[#allocation6 + $0xe0] sm:$0xff]  ;;  %s471_s15 = smov [#allocation11]   ;;  %s284_s19 = sshll.u32 %s534_s5, 4  ;;  %s285_s19 = int_to_ptr.hbm [resolvable:$true] %s284_s19 }
  0x15   :  { %122 = vmatpush.msra.mxu0 %v114_v0  ;;  %301 = vmatpush.msra.mxu3 %v114_v0  ;;  %v110_v2 = vld [vmem:[#allocation6 + $0xd0] sm:$0xff]  ;;  %v108_v3 = vld [vmem:[#allocation6 + $0xc0] sm:$0xff]  ;;  %v115_v4 = vld [vmem:[#allocation6 + $0xf8] sm:$0xff]  ;;  %s282_s16 = sshll.u32 %s471_s15, 4  ;;  %s283_s16 = int_to_ptr.vmem [resolvable:$true] %s282_s16 }
  0x16   :  { %v113_v5 = vld [vmem:[#allocation6 + $0xe8] sm:$0xff]  ;;  %v106_v6 = vld [vmem:[#allocation6 + $0xb0] sm:$0xff]  ;;  %145 = vmatpush.msra.mxu1 %v115_v4  ;;  %v111_v7 = vld [vmem:[#allocation6 + $0xd8] sm:$0xff] }
  0x17   :  { %123 = vmatpush.msra.mxu0 %v112_v1  ;;  %302 = vmatpush.msra.mxu3 %v112_v1  ;;  %v104_v8 = vld [vmem:[#allocation6 + $0xa0] sm:$0xff]  ;;  %v109_v9 = vld [vmem:[#allocation6 + $0xc8] sm:$0xff]  ;;  %v102_v10 = vld [vmem:[#allocation6 + $0x90] sm:$0xff] }
  0x18   :  { %146 = vmatpush.msra.mxu1 %v113_v5  ;;  %v107_v11 = vld [vmem:[#allocation6 + $0xb8] sm:$0xff]  ;;  %v100_v12 = vld [vmem:[#allocation6 + $0x80] sm:$0xff]  ;;  %v105_v13 = vld [vmem:[#allocation6 + $0xa8] sm:$0xff] }
  0x19   :  { %124 = vmatpush.msra.mxu0 %v110_v2  ;;  %303 = vmatpush.msra.mxu3 %v110_v2  ;;  %v98_v14 = vld [vmem:[#allocation6 + $0x70] sm:$0xff]  ;;  %v103_v15 = vld [vmem:[#allocation6 + $0x98] sm:$0xff]  ;;  %v96_v16 = vld [vmem:[#allocation6 + $0x60] sm:$0xff] }
  0x1a   :  { %147 = vmatpush.msra.mxu1 %v111_v7  ;;  %v101_v17 = vld [vmem:[#allocation6 + $0x88] sm:$0xff]  ;;  %v94_v18 = vld [vmem:[#allocation6 + $0x50] sm:$0xff]  ;;  %v99_v19 = vld [vmem:[#allocation6 + $0x78] sm:$0xff] }
  0x1b   :  { %125 = vmatpush.msra.mxu0 %v108_v3  ;;  %304 = vmatpush.msra.mxu3 %v108_v3  ;;  %v92_v20 = vld [vmem:[#allocation6 + $0x40] sm:$0xff]  ;;  %v97_v21 = vld [vmem:[#allocation6 + $0x68] sm:$0xff]  ;;  %v90_v22 = vld [vmem:[#allocation6 + $0x30] sm:$0xff] }
  0x1c   :  { %148 = vmatpush.msra.mxu1 %v109_v9  ;;  %v95_v23 = vld [vmem:[#allocation6 + $0x58] sm:$0xff]  ;;  %v88_v24 = vld [vmem:[#allocation6 + $0x20] sm:$0xff]  ;;  %v93_v25 = vld [vmem:[#allocation6 + $0x48] sm:$0xff] }
  0x1d   :  { %126 = vmatpush.msra.mxu0 %v106_v6  ;;  %305 = vmatpush.msra.mxu3 %v106_v6  ;;  %v86_v26 = vld [vmem:[#allocation6 + $0x10] sm:$0xff]  ;;  %v91_v27 = vld [vmem:[#allocation6 + $0x38] sm:$0xff]  ;;  %v84_v28 = vld [vmem:[#allocation6] sm:$0xff] }
  0x1e   :  { %149 = vmatpush.msra.mxu1 %v107_v11  ;;  %v82_v29 = vld [vmem:[#allocation3] sm:$0xff]  ;;  %v83_v30 = vld [vmem:[#allocation3 + $0x8] sm:$0xff]  ;;  %v89_v31 = vld [vmem:[#allocation6 + $0x28] sm:$0xff] }
  0x1f   :  { %127 = vmatpush.msra.mxu0 %v104_v8  ;;  %306 = vmatpush.msra.mxu3 %v104_v8  ;;  %v87_v32 = vld [vmem:[#allocation6 + $0x18] sm:$0xff]  ;;  %v85_v33 = vld [vmem:[#allocation6 + $0x8] sm:$0xff]  ;;  %v116_v46 = vld [vmem:[#allocation8] sm:$0x3] }
  0x20   :  { %150 = vmatpush.msra.mxu1 %v105_v13  ;;  %v225_v34 = vld [vmem:[#allocation9 + $0x78] sm:$0xff]  ;;  %v224_v35 = vld [vmem:[#allocation9 + $0x70] sm:$0xff]  ;;  %v223_v36 = vld [vmem:[#allocation9 + $0x68] sm:$0xff]  ;;  %v118_v48 = vperm.slane %v116_v46, 0  ;;  %v119_v5 = vperm.slane %v116_v46, 1 }
  0x21   :  { %128 = vmatpush.msra.mxu0 %v102_v10  ;;  %307 = vmatpush.msra.mxu3 %v102_v10  ;;  %v222_v37 = vld [vmem:[#allocation9 + $0x60] sm:$0xff]  ;;  %v221_v38 = vld [vmem:[#allocation9 + $0x58] sm:$0xff]  ;;  %v220_v39 = vld [vmem:[#allocation9 + $0x50] sm:$0xff] }
  0x22   :  { %151 = vmatpush.msra.mxu1 %v103_v15  ;;  %226 = vmatpush.msra.mxu2 %v225_v34  ;;  %v219_v40 = vld [vmem:[#allocation9 + $0x48] sm:$0xff]  ;;  %v218_v41 = vld [vmem:[#allocation9 + $0x40] sm:$0xff]  ;;  %v217_v42 = vld [vmem:[#allocation9 + $0x38] sm:$0xff] }
  0x23   :  { %129 = vmatpush.msra.mxu0 %v100_v12  ;;  %308 = vmatpush.msra.mxu3 %v100_v12  ;;  %v216_v43 = vld [vmem:[#allocation9 + $0x30] sm:$0xff]  ;;  %v215_v44 = vld [vmem:[#allocation9 + $0x28] sm:$0xff]  ;;  %v214_v45 = vld [vmem:[#allocation9 + $0x20] sm:$0xff] }
  0x24   :  { %152 = vmatpush.msra.mxu1 %v101_v17  ;;  %227 = vmatpush.msra.mxu2 %v224_v35  ;;  %v213_v47 = vld [vmem:[#allocation9 + $0x18] sm:$0xff]  ;;  %v212_v49 = vld [vmem:[#allocation9 + $0x10] sm:$0xff]  ;;  %v211_v50 = vld [vmem:[#allocation9 + $0x8] sm:$0xff] }
  0x25   :  { %130 = vmatpush.msra.mxu0 %v98_v14  ;;  %309 = vmatpush.msra.mxu3 %v98_v14  ;;  %v210_v53 = vld [vmem:[#allocation9] sm:$0xff] }
  0x26   :  { %153 = vmatpush.msra.mxu1 %v99_v19  ;;  %228 = vmatpush.msra.mxu2 %v223_v36 }
  0x27   :  { %131 = vmatpush.msra.mxu0 %v96_v16  ;;  %310 = vmatpush.msra.mxu3 %v96_v16 }
  0x28   :  { %154 = vmatpush.msra.mxu1 %v97_v21  ;;  %229 = vmatpush.msra.mxu2 %v222_v37 }
  0x29   :  { %132 = vmatpush.msra.mxu0 %v94_v18  ;;  %311 = vmatpush.msra.mxu3 %v94_v18 }
  0x2a   :  { %155 = vmatpush.msra.mxu1 %v95_v23  ;;  %230 = vmatpush.msra.mxu2 %v221_v38 }
  0x2b   :  { %133 = vmatpush.msra.mxu0 %v92_v20  ;;  %312 = vmatpush.msra.mxu3 %v92_v20 }
  0x2c   :  { %156 = vmatpush.msra.mxu1 %v93_v25  ;;  %231 = vmatpush.msra.mxu2 %v220_v39 }
  0x2d   :  { %134 = vmatpush.msra.mxu0 %v90_v22  ;;  %313 = vmatpush.msra.mxu3 %v90_v22 }
  0x2e   :  { %157 = vmatpush.msra.mxu1 %v91_v27  ;;  %232 = vmatpush.msra.mxu2 %v219_v40  ;;  %v326_v27 = vld [vmem:[%s533_s4] ss:$0 sm:$0xff] }
  0x2f   :  { %135 = vmatpush.msra.mxu0 %v88_v24  ;;  %314 = vmatpush.msra.mxu3 %v88_v24 }
  0x30   :  { %158 = vmatpush.msra.mxu1 %v89_v31  ;;  %233 = vmatpush.msra.mxu2 %v218_v41 }
  0x31   :  { %136 = vmatpush.msra.mxu0 %v86_v26  ;;  %315 = vmatpush.msra.mxu3 %v86_v26 }
  0x32   :  { %159 = vmatpush.msra.mxu1 %v87_v32  ;;  %234 = vmatpush.msra.mxu2 %v217_v42 }
  0x33   :  { %137 = vmatpush.msra.mxu0 %v84_v28  ;;  %316 = vmatpush.msra.mxu3 %v84_v28 }
  0x34   :  { %138 = vmatmul.f32.vlgmr.msra.gmra.mxu0 %v82_v29  ;;  %141 = vmatmul.f32.vlgmr.msra.gmra.mxu3 %v83_v30 }
  0x35   :  { %160 = vmatpush.msra.mxu1 %v85_v33  ;;  %235 = vmatpush.msra.mxu2 %v216_v43 }
  0x36   :  { %161 = vmatmul.f32.vlgmr.msra.gmra.mxu1 %v82_v29 }
  0x37   :  { %236 = vmatpush.msra.mxu2 %v215_v44 }
  0x39   :  { %237 = vmatpush.msra.mxu2 %v214_v45 }
  0x3b   :  { %238 = vmatpush.msra.mxu2 %v213_v47 }
  0x3d   :  { %239 = vmatpush.msra.mxu2 %v212_v49 }
  0x3e   :  { %164 = vmatmul.f32.gmra.mxu1 %v83_v30 }
  0x3f   :  { %240 = vmatpush.msra.mxu2 %v211_v50 }
  0x41   :  { %241 = vmatpush.msra.mxu2 %v210_v53 }
  0xb1   :  { %v139_v51 = vpop.f32.mrf.mxu0 }
  0xb2   :  { %v140_v52 = vadd.f32 %v139_v51, %v118_v48 }
  0xb3   :  { %v162_v2 = vpop.f32.mrf.mxu1 }
  0xb4   :  { %v299_v54 = vmul.f32 -1.442695, %v140_v52  ;;  %v163_v12 = vadd.f32 %v162_v2, %v119_v5 }
  0xb6   :  { %327 = vpow2.f32 %v299_v54 }
  0xb7   :  { %v142_v55 = vpop.f32.mrf.mxu3 }
  0xb8   :  { %v143_v56 = vadd.f32 %v142_v55, %v118_v48 }
  0xba   :  { %v300_v57 = vmul.f32 -1.442695, %v143_v56 }
  0xbb   :  { %v165_v21 = vpop.f32.mrf.mxu1 }
  0xbc   :  { %v328_v58 = vpop.eup %327  ;;  %329 = vpow2.f32 %v300_v57  ;;  %v166_v25 = vadd.f32 %v165_v21, %v119_v5 }
  0xbd   :  { %v174_v59 = vadd.f32 1.0, %v328_v58 }
  0xbf   :  { %331 = vrcp.f32 %v174_v59  ;;  %v187_v1 = vand.u32 2147483648, %v174_v59  ;;  %v185_v4 = vand.u32 2147483647, %v174_v59  ;;  %vm181_vm1 = vweird.f32 %v174_v59 }
  0xc1   :  { %v188_v9 = vor.u32 1.1754944e-38, %v187_v1  ;;  %vm186_vm3 = vcmp.eq.f32.partialorder %v185_v4, 8.507059e+37 }
  0xc2   :  { %v330_v60 = vpop.eup %329 }
  0xc3   :  { %v175_v61 = vadd.f32 1.0, %v330_v60 }
  0xc5   :  { %v332_v62 = vpop.eup %331  ;;  %333 = vrcp.f32 %v175_v61  ;;  %v202_v14 = vand.u32 2147483648, %v175_v61  ;;  %v200_v17 = vand.u32 2147483647, %v175_v61  ;;  %vm196_vm5 = vweird.f32 %v175_v61 }
  0xc6   :  { %v177_v63 = vmul.f32 %v332_v62, %v174_v59  ;;  %vm182_vm0 = vweird.f32 %v332_v62 }
  0xc7   :  { %vm183_vm2 = vmor %vm181_vm1, %vm182_vm0  ;;  %v203_v20 = vor.u32 1.1754944e-38, %v202_v14  ;;  %vm201_vm7 = vcmp.eq.f32.partialorder %v200_v17, 8.507059e+37 }
  0xc8   :  { %v178_v0 = vsub.f32 1.0, %v177_v63 }
  0xca   :  { %v179_v3 = vmul.f32 %v332_v62, %v178_v0 }
  0xcb   :  { %v334_v6 = vpop.eup %333 }
  0xcc   :  { %v180_v7 = vadd.f32 %v332_v62, %v179_v3  ;;  %v192_v8 = vmul.f32 %v334_v6, %v175_v61  ;;  %vm197_vm4 = vweird.f32 %v334_v6 }
  0xcd   :  { %vm198_vm6 = vmor %vm196_vm5, %vm197_vm4 }
  0xce   :  { %v184_v10 = vsel %vm183_vm2, %v332_v62, %v180_v7  ;;  %v193_v11 = vsub.f32 1.0, %v192_v8 }
  0xcf   :  { %v189_v13 = vsel %vm186_vm3, %v188_v9, %v184_v10 }
  0xd0   :  { %v206_v15 = vmul.f32 %v189_v13, %v140_v52  ;;  %v194_v16 = vmul.f32 %v334_v6, %v193_v11 }
  0xd2   :  { %v195_v18 = vadd.f32 %v334_v6, %v194_v16  ;;  %v208_v19 = vmul.f32 %v206_v15, %v163_v12 }
  0xd4   :  { %v199_v22 = vsel %vm198_vm6, %v334_v6, %v195_v18  ;;  %242 = vmatmul.f32.vlgmr.msra.gmra.mxu2 %v208_v19 }
  0xd5   :  { %v204_v23 = vsel %vm201_vm7, %v203_v20, %v199_v22 }
  0xd6   :  { %v207_v24 = vmul.f32 %v204_v23, %v143_v56 }
  0xd8   :  { %v209_v26 = vmul.f32 %v207_v24, %v166_v25 }
  0xdc   :  { %245 = vmatmul.f32.gmra.mxu2 %v209_v26 }
 0x157   :  { %v243_v28 = vpop.f32.mrf.mxu2 }
 0x158   :  { %v274_v29 = vadd.f32 %v326_v27, %v243_v28 }
 0x15a   :  { %276 = vst [vmem:[#allocation11] sm:$0xff] %v274_v29 }
 0x15f   :  { %v246_v30 = vpop.f32.mrf.mxu2 }
 0x160   :  { %v275_v31 = vadd.f32 %v326_v27, %v246_v30 }
 0x162   :  { %277 = vst [vmem:[#allocation11 + $0x8] sm:$0xff] %v275_v31 }
 0x163   :  { %290 = dma.vmem_to_hbm [thread:$0]  %s283_s16, 256, %s285_s19, [#allocation5], %s467_s30, %s467_s30, %s468_s6  }
 0x164   :  { %461 = dma.done.wait [#allocation5], 256  }
 0x165   :  { %462 = vsyncadd [#allocation5], 4294967040 }
 0x166   :  { %295 = vsyncpa [#allocation4], 1 }
 0x167   :  { %296 = vsyncpa [#allocation7], 1 }
 0x168   :  { %297 = vsyncpa [#allocation10], 1 }
 0x169   :  { %298 = vsyncpa [#allocation5], 1 }

</bundles_post_ra>
